<compile_context>
chip_gen: v6e
topology: v6e:2x2x1
jax: 0.10.0
libtpu: 0.0.40
codegen_flags: <defaults>
</compile_context>

<pallas_src>
import jax
import jax.numpy as jnp
from jax.experimental import pallas as pl
from jax.experimental.pallas import tpu as pltpu


TILE_R = 8  # row tile; rows are zero-padded in the wrapper to a multiple of this


def _encoder_kernel(x_ref, wt_ref, h_ref, acc_ref):
    # x_ref  : (TILE_R, in_features)        one row tile of the input
    # wt_ref : (in_features, out_features)  fc weight, pre-transposed (hoisted)
    # h_ref  : (1, out_features)            final output  h = sum_i fc(x)[i]
    # acc_ref: (1, in_features) f32 scratch accumulator, resident across grid
    i = pl.program_id(0)

    @pl.when(i == 0)
    def _():
        acc_ref[...] = jnp.zeros_like(acc_ref)

    # Fuse the "h += code[i]" loop into a column-sum taken BEFORE the matmul:
    #   sum_i (x @ W^T)[i] == (sum_i x[i]) @ W^T
    acc_ref[...] += jnp.sum(x_ref[...].astype(jnp.float32), axis=0, keepdims=True)

    @pl.when(i == pl.num_programs(0) - 1)
    def _():
        h_ref[...] = jnp.dot(
            acc_ref[...], wt_ref[...], preferred_element_type=jnp.float32
        ).astype(h_ref.dtype)


def encoder_forward(x, W):
    """JAX/Pallas equivalent of Encoder.forward.

    x: (rows, in_features) float32
    W: (out_features, in_features) float32   (nn.Linear weight, bias=False)
    returns: (1, out_features) float32  == sum over rows of (x @ W^T)
    """
    rows, in_features = x.shape
    out_features = W.shape[0]

    # Parameter prep (transpose) hoisted out of the hot path.
    wt = W.T  # (in_features, out_features)

    # Zero-pad rows to a multiple of TILE_R (zero rows contribute nothing).
    pad = (-rows) % TILE_R
    if pad:
        x = jnp.pad(x, ((0, pad), (0, 0)))
    n_tiles = x.shape[0] // TILE_R

    return pl.pallas_call(
        _encoder_kernel,
        out_shape=jax.ShapeDtypeStruct((1, out_features), x.dtype),
        grid=(n_tiles,),
        in_specs=[
            pl.BlockSpec((TILE_R, in_features), lambda i: (i, 0)),
            # weight block index is constant -> Pallas keeps it resident (no re-DMA)
            pl.BlockSpec((in_features, out_features), lambda i: (0, 0)),
        ],
        out_specs=pl.BlockSpec((1, out_features), lambda i: (0, 0)),
        scratch_shapes=[pltpu.VMEM((1, in_features), jnp.float32)],
        compiler_params=pltpu.CompilerParams(
            dimension_semantics=("arbitrary",)  # reduction over row tiles
        ),
    )(x, wt)


def reference_forward(x, W):
    code = x @ W.T                         # nn.Linear(bias=False)
    return jnp.sum(code, axis=0, keepdims=True)   # the python "h += code[i]" loop


if __name__ == "__main__":
    rows = 8
    in_features = 32
    out_features = 16

    key = jax.random.PRNGKey(0)
    k_x, k_w = jax.random.split(key, 2)

    x = jax.random.uniform(k_x, (rows, in_features), jnp.float32, -1.0, 1.0)
    # Deterministic weight init (stand-in for nn.Linear's default init)
    W = jax.random.uniform(k_w, (out_features, in_features), jnp.float32, -0.5, 0.5)

    out = encoder_forward(x, W)
    out = jax.block_until_ready(out)

    ref = reference_forward(x, W)
    assert out.shape == (1, out_features), out.shape
    assert jnp.allclose(out, ref, atol=1e-4, rtol=1e-4), (out, ref)

    print("KERNEL_OK")
</pallas_src>

<mosaic_0001>
module attributes {stable_mosaic.version = 11 : i64} {
  func.func @_encoder_kernel(%arg0: i32, %arg1: memref<8x32xf32, #tpu.memory_space<vmem>>, %arg2: memref<32x16xf32, #tpu.memory_space<vmem>>, %arg3: memref<1x16xf32, #tpu.memory_space<vmem>>, %arg4: memref<1x32xf32, #tpu.memory_space<vmem>>) attributes {dimension_semantics = [#tpu.dimension_semantics<arbitrary>], iteration_bounds = array<i64: 1>, scalar_prefetch = 0 : i64, scratch_operands = 1 : i64, tpu.core_type = #tpu.core_type<tc>, window_params = [{transform_indices = @transform_0, window_bounds = array<i64: 8, 32>}, {pipeline_mode = #tpu.pipeline_mode<synchronous>, transform_indices = @transform_1, window_bounds = array<i64: 32, 16>}, {pipeline_mode = #tpu.pipeline_mode<synchronous>, transform_indices = @transform_2, window_bounds = array<i64: 1, 16>}]} {
    %c0_i32 = arith.constant 0 : i32
    %0 = arith.cmpi eq, %arg0, %c0_i32 : i32
    %1 = arith.extui %0 : i1 to i32
    %c0_i32_0 = arith.constant 0 : i32
    %2 = arith.cmpi ne, %1, %c0_i32_0 : i32
    scf.if %2 {
      %cst_8 = arith.constant 0.000000e+00 : f32
      %12 = vector.broadcast %cst_8 : f32 to vector<1x32xf32>
      %c0_9 = arith.constant 0 : index
      %c0_10 = arith.constant 0 : index
      %13 = vector.load %arg4[%c0_9, %c0_10] : memref<1x32xf32, #tpu.memory_space<vmem>>, vector<1x32xf32>
      tpu.vector_store %arg4[%c0_9, %c0_10], %12 {strides = array<i32>} : memref<1x32xf32, #tpu.memory_space<vmem>>, vector<1x32xf32>,
    } else {
    }
    %c0 = arith.constant 0 : index
    %c0_1 = arith.constant 0 : index
    %3 = vector.load %arg4[%c0, %c0_1] : memref<1x32xf32, #tpu.memory_space<vmem>>, vector<1x32xf32>
    %c0_2 = arith.constant 0 : index
    %c0_3 = arith.constant 0 : index
    %4 = vector.load %arg1[%c0_2, %c0_3] : memref<8x32xf32, #tpu.memory_space<vmem>>, vector<8x32xf32>
    %cst = arith.constant dense<0.000000e+00> : vector<32xf32>
    %5 = vector.multi_reduction <add>, %4, %cst [0] : vector<8x32xf32> to vector<32xf32>
    %6 = vector.shape_cast %5 : vector<32xf32> to vector<1x32xf32>
    %7 = arith.addf %3, %6 : vector<1x32xf32>
    %c0_4 = arith.constant 0 : index
    %c0_5 = arith.constant 0 : index
    %8 = vector.load %arg4[%c0_4, %c0_5] : memref<1x32xf32, #tpu.memory_space<vmem>>, vector<1x32xf32>
    tpu.vector_store %arg4[%c0_4, %c0_5], %7 {strides = array<i32>} : memref<1x32xf32, #tpu.memory_space<vmem>>, vector<1x32xf32>,
    %c0_i32_6 = arith.constant 0 : i32
    %9 = arith.cmpi eq, %arg0, %c0_i32_6 : i32
    %10 = arith.extui %9 : i1 to i32
    %c0_i32_7 = arith.constant 0 : i32
    %11 = arith.cmpi ne, %10, %c0_i32_7 : i32
    scf.if %11 {
      %c0_8 = arith.constant 0 : index
      %c0_9 = arith.constant 0 : index
      %12 = vector.load %arg4[%c0_8, %c0_9] : memref<1x32xf32, #tpu.memory_space<vmem>>, vector<1x32xf32>
      %c0_10 = arith.constant 0 : index
      %c0_11 = arith.constant 0 : index
      %13 = vector.load %arg2[%c0_10, %c0_11] : memref<32x16xf32, #tpu.memory_space<vmem>>, vector<32x16xf32>
      %cst_12 = arith.constant dense<0.000000e+00> : vector<1x16xf32>
      %14 = tpu.matmul %12, %13, %cst_12 {dimension_numbers = #tpu.dot_dimension_numbers<[1], [0], [0], [1], [0, 0, 1, 1], [], []>} : vector<1x32xf32>, vector<32x16xf32>, vector<1x16xf32> -> vector<1x16xf32>
      %c0_13 = arith.constant 0 : index
      %c0_14 = arith.constant 0 : index
      %15 = vector.load %arg3[%c0_13, %c0_14] : memref<1x16xf32, #tpu.memory_space<vmem>>, vector<1x16xf32>
      tpu.vector_store %arg3[%c0_13, %c0_14], %14 {strides = array<i32>} : memref<1x16xf32, #tpu.memory_space<vmem>>, vector<1x16xf32>,
    } else {
    }
    return
  }
  func.func @transform_0(%arg0: i32) -> (i32, i32) {
    %c0_i32 = arith.constant 0 : i32
    %c0_i32_0 = arith.constant 0 : i32
    return %arg0, %c0_i32 : i32, i32
  }
  func.func @transform_1(%arg0: i32) -> (i32, i32) {
    %c0_i32 = arith.constant 0 : i32
    %c0_i32_0 = arith.constant 0 : i32
    %c0_i32_1 = arith.constant 0 : i32
    return %c0_i32, %c0_i32_0 : i32, i32
  }
  func.func @transform_2(%arg0: i32) -> (i32, i32) {
    %c0_i32 = arith.constant 0 : i32
    %c0_i32_0 = arith.constant 0 : i32
    %c0_i32_1 = arith.constant 0 : i32
    return %c0_i32, %c0_i32_0 : i32, i32
  }
}

</mosaic_0001>

<bundles_post_ra>
// kernel: tpu_custom_call.1
= control target key start
LH: loop header
LB: loop body
LE: loop exit
PB: predicated region body
PF: predicated region fallthrough
CT: control target
= control target key end

     0   :  { %vm16_vm0 = vcmask 253952   ;;  %v170_v1 = vmov 0.0   ;;  %vm171_vm1 = vmmov 0   ;;  %vm20_vm2 = vcmask 261120   ;;  %s210_s0 = inlined_call_operand.vmem [shape: f32[8,32], index: 0, kind: input, shape index: {}]   ;;  %s211_s1 = inlined_call_operand.vmem [shape: f32[32,16], index: 1, kind: input, shape index: {}]   ;;  %s212_s2 = inlined_call_operand.hbm [shape: f32[1,16], index: 2, kind: output, shape index: {}]  }
   0x1   :  { %v38_v0 = vld [vmem:[%s211_s1 + $0x18] sm:$0xff]  ;;  %17 = vst.msk [vmem:[#allocation2] sm:$0x1] %vm16_vm0, %v170_v1  ;;  %134 = vmatprep.subr.mxu0 %v170_v1  ;;  %v37_v2 = vld [vmem:[%s211_s1 + $0x10] sm:$0xff]  ;;  %142 = vmatprep.mubr.msk.f32.mxu0 %vm171_vm1, %v170_v1  ;;  %v19_v3 = vld [vmem:[%s210_s0] sm:$0xff] }
   0x2   :  { %7 = vsyncpa [#allocation4], 0  ;;  %135 = vmatpush3.msra.mxu0 %v38_v0  ;;  %v21_v4 = vsel %vm20_vm2, %v19_v3, 0.0  ;;  %v36_v5 = vld [vmem:[%s211_s1 + $0x8] sm:$0xff]  ;;  %v35_v7 = vld [vmem:[%s211_s1] sm:$0xff]  ;;  %s172_s0 = smov [#allocation3]  }
   0x3   :  { %136 = vmatprep.subr.mxu0 %v170_v1  ;;  %v22_v6 = vrot.slane %v21_v4, 4  ;;  %s120_s19 = sshll.u32 %s172_s0, 4  ;;  %vm112_vm3 = vcmask 122880   ;;  %s121_s19 = int_to_ptr.vmem [resolvable:$true] %s120_s19 }
   0x4   :  { %137 = vmatpush3.msra.mxu0 %v37_v2  ;;  %s148_s1 = scalar_lea.vmem %s121_s19, 16  ;;  %s152_s20 = scalar_lea.vmem %s121_s19, 32 }
   0x5   :  { %138 = vmatprep.subr.mxu0 %v170_v1  ;;  %v23_v8 = vadd.f32 %v22_v6, %v21_v4  ;;  %p149_p0 = scmp.ne.s32.totalorder %s121_s19, %s148_s1  ;;  %p153_p1 = scmp.lt.s32.totalorder %s121_s19, %s121_s19 }
   0x6   :  { %139 = vmatpush3.msra.mxu0 %v36_v5  ;;  %p154_p2 = scmp.lt.s32.totalorder %s152_s20, %s148_s1 }
   0x7   :  { %140 = vmatprep.subr.mxu0 %v170_v1  ;;  %v24_v9 = vrot.slane %v23_v8, 2 }
   0x8   :  { %141 = vmatpush3.msra.mxu0 %v35_v7  ;;  %v18_v12 = vld [vmem:[#allocation2] sm:$0x1]  ;;  %p155_p3 = por %p154_p2, %p153_p1 }
   0x9   :  { %v25_v10 = vadd.f32 %v24_v9, %v23_v8 }
   0xa   :  { %p156_p4 = pnand %p155_p3, %p149_p0 }
   0xb   :  { %v26_v11 = vrot.slane %v25_v10, 1 }
   0xd   :  { %v27_v13 = vadd.f32 %v26_v11, %v25_v10 }
   0xf   :  { %v28_v14 = vadd.f32 %v27_v13, %v18_v12 }
  0x11   :  { %30 = vst.msk [vmem:[#allocation2] sm:$0x1] %vm16_vm0, %v28_v14 }
  0x18   :  { %v34_v15 = vld [vmem:[#allocation2] sm:$0x1] }
  0x19   :  { %143 = vmatmul.mubr.msk.f32.vlgmr.msra.gmra.mxu0 %vm20_vm2, %v34_v15 }
  0xd9   :  { %v108_v16 = vpop.f32.mrf.mxu0 }
  0xda   :  { %113 = vst.msk [vmem:[#allocation3] sm:$0x1] %vm112_vm3, %v108_v16 }
  0xdb   :  { %v144_v17 = vpop.f32.mrf.mxu0 }
  0xdc   :  { %159 = shalt.err (!%p156_p4)
}
  0xdd   :  { %123 = dma.vmem_to_hbm [thread:$0]  %s121_s19, 16, %s212_s2, [#allocation4]  }
  0xde   :  { %168 = dma.done.wait [#allocation4], 16  }
  0xdf   :  { %169 = vsyncadd [#allocation4], 4294967280 }
  0xe0   :  { %127 = vsyncpa [#allocation4], 1 }

</bundles_post_ra>
